<compile_context>
chip_gen: v6e
topology: v6e:2x2x1
jax: 0.10.0
libtpu: 0.0.40
codegen_flags: <defaults>
</compile_context>

<pallas_src>
import functools
import math

import jax
import jax.numpy as jnp
from jax import lax
from jax.experimental import pallas as pl
from jax.experimental.pallas import tpu as pltpu

LANE = 128
_PY_UNROLL_MAX = 64           # fully unroll strip loops up to this many strips
_FORI_UNROLL = 8


def adaptive_kernel_size(channels, b=1, gamma=2):
    # Matches the provided PyTorch module exactly: int(abs(log2(C)/gamma) + b).
    k = int(abs(math.log2(channels) / gamma) + b)
    return k if k % 2 else k + 1


def _vmem_capacity_bytes():
    """Per-core VMEM capacity (bytes), conservative fallback if unqueryable."""
    try:
        info = pltpu.get_tpu_info()
        cap = getattr(info, "vmem_capacity_bytes", None)
        if cap:
            return int(cap)
    except Exception:
        pass
    return 64 << 20  # conservative: v7x per-TensorCore capacity


def _channel_conv_sigmoid(pooled, w_ref, ksize):
    """pooled: (C, 1) f32; w_ref: SMEM (1, ksize) f32 -> sigmoid(conv1d) (C, 1) f32."""
    C = pooled.shape[0]
    pad = (ksize - 1) // 2
    if pad:
        z = jnp.zeros((pad, 1), jnp.float32)
        padded = jnp.concatenate([z, pooled, z], axis=0)     # (C + 2*pad, 1)
    else:
        padded = pooled
    conv = jnp.zeros((C, 1), jnp.float32)
    for j in range(ksize):                                   # ksize tiny & static
        conv = conv + w_ref[0, j] * padded[j:j + C, :]
    return jax.nn.sigmoid(conv)


# --------------------------------------------------------------------------- #
# Fast path: one fused kernel, one (C, hw) block per batch element.
# --------------------------------------------------------------------------- #
def eca_fused_kernel(w_ref, x_ref, o_ref, *, ksize, inv_hw):
    C, hw = x_ref.shape
    nstrips = hw // LANE
    rem = hw - nstrips * LANE                   # static tail width (< 128)

    # ---- Phase 1: global average pool via 128-lane strip accumulation. ----
    sums = jnp.zeros((C, 1), jnp.float32)
    if nstrips > 0:
        acc = jnp.zeros((C, LANE), jnp.float32)
        if nstrips <= _PY_UNROLL_MAX:
            for i in range(nstrips):
                acc = acc + x_ref[:, pl.ds(i * LANE, LANE)].astype(jnp.float32)
        else:
            def pool_body(i, a):
                start = pl.multiple_of(i * LANE, LANE)
                return a + x_ref[:, pl.ds(start, LANE)].astype(jnp.float32)
            acc = lax.fori_loop(0, nstrips, pool_body, acc, unroll=_FORI_UNROLL)
        sums = jnp.sum(acc, axis=1, keepdims=True)           # single XLU reduce
    if rem:
        tail = x_ref[:, pl.ds(nstrips * LANE, rem)].astype(jnp.float32)
        sums = sums + jnp.sum(tail, axis=1, keepdims=True)
    pooled = sums * inv_hw                                    # (C, 1) f32

    # ---- Channel conv + sigmoid (negligible cost). ----
    attn = _channel_conv_sigmoid(pooled, w_ref, ksize).astype(x_ref.dtype)   # (C, 1)
    attn_strip = jnp.broadcast_to(attn, (C, LANE))            # hoisted lane-broadcast

    # ---- Phase 2: scale + store in lane-dense 128-wide strips. ----
    if nstrips > 0:
        if nstrips <= _PY_UNROLL_MAX:
            for i in range(nstrips):
                sl = pl.ds(i * LANE, LANE)
                o_ref[:, sl] = x_ref[:, sl] * attn_strip
        else:
            def scale_body(i, carry):
                start = pl.multiple_of(i * LANE, LANE)
                sl = pl.ds(start, LANE)
                o_ref[:, sl] = x_ref[:, sl] * attn_strip
                return carry
            lax.fori_loop(0, nstrips, scale_body, 0, unroll=_FORI_UNROLL)
    if rem:
        sl = pl.ds(nstrips * LANE, rem)
        o_ref[:, sl] = x_ref[:, sl] * attn                    # single masked tail store


def _eca_fused_call(x2, w2, *, ksize, inv_hw, vmem_limit, donate_x):
    B, C, hw = x2.shape
    itemsize = jnp.dtype(x2.dtype).itemsize
    cost = pl.CostEstimate(
        flops=2 * B * C * hw + 2 * B * C * ksize,
        transcendentals=B * C,
        bytes_accessed=2 * B * C * hw * itemsize + ksize * 4,
    )
    extra = {"input_output_aliases": {1: 0}} if donate_x else {}
    return pl.pallas_call(
        functools.partial(eca_fused_kernel, ksize=ksize, inv_hw=inv_hw),
        out_shape=jax.ShapeDtypeStruct((B, C, hw), x2.dtype),
        grid=(B,),
        in_specs=[
            pl.BlockSpec(memory_space=pltpu.MemorySpace.SMEM),            # conv weights
            pl.BlockSpec((pl.Squeezed(), C, hw), lambda b: (b, 0, 0)),    # x (per batch)
        ],
        out_specs=pl.BlockSpec((pl.Squeezed(), C, hw), lambda b: (b, 0, 0)),
        compiler_params=pltpu.CompilerParams(
            dimension_semantics=("parallel",),
            vmem_limit_bytes=int(vmem_limit),
        ),
        cost_estimate=cost,
        **extra,
    )(w2, x2)


# --------------------------------------------------------------------------- #
# Fallback path: two-pass HW-tiled (for blocks that do not fit the VMEM budget).
# --------------------------------------------------------------------------- #
def eca_pool_kernel(w_ref, x_ref, attn_ref, *, ksize, inv_hw, hw, thw):
    t = pl.program_id(1)
    nt = pl.num_programs(1)

    @pl.when(t == 0)
    def _():
        attn_ref[...] = jnp.zeros_like(attn_ref)

    xs = x_ref[...].astype(jnp.float32)                       # (C, thw)
    rem = hw % thw
    if rem:
        # Last tile extends past hw: out-of-bounds lanes hold unspecified data,
        # so mask them out of the sum.
        lane = lax.broadcasted_iota(jnp.int32, xs.shape, 1)
        limit = jnp.where(t == nt - 1, rem, thw)
        xs = jnp.where(lane < limit, xs, 0.0)
    attn_ref[...] += jnp.sum(xs, axis=1, keepdims=True)

    @pl.when(t == nt - 1)
    def _():
        pooled = attn_ref[...] * inv_hw
        attn_ref[...] = _channel_conv_sigmoid(pooled, w_ref, ksize)


def eca_scale_kernel(attn_ref, x_ref, o_ref):
    attn = attn_ref[...].astype(x_ref.dtype)                  # (C, 1)
    o_ref[...] = x_ref[...] * attn                            # OOB lanes of last tile dropped


def _eca_tiled_call(x2, w2, *, ksize, inv_hw, budget, donate_x, tile_hw=None):
    B, C, hw = x2.shape
    itemsize = jnp.dtype(x2.dtype).itemsize

    if tile_hw is not None:
        thw = max(LANE, (int(tile_hw) // LANE) * LANE)
    else:
        lane_bytes = 4 * C * itemsize          # in + out, double-buffered, per lane
        thw = max(LANE, ((budget - (4 << 20)) // lane_bytes) // LANE * LANE)
    thw = min(thw, pl.cdiv(hw, LANE) * LANE)
    nt = pl.cdiv(hw, thw)

    needed = 4 * C * thw * itemsize + (4 << 20)
    vmem_limit = int(min(max(needed, 32 << 20), budget))

    # Pass 1: per-channel pooling + channel conv + sigmoid -> attn (B, C, 1) f32.
    pool_cost = pl.CostEstimate(
        flops=2 * B * C * hw + 2 * B * C * ksize,
        transcendentals=B * C,
        bytes_accessed=B * C * hw * itemsize + B * C * 4 + ksize * 4,
    )
    attn = pl.pallas_call(
        functools.partial(eca_pool_kernel, ksize=ksize, inv_hw=inv_hw, hw=hw, thw=thw),
        out_shape=jax.ShapeDtypeStruct((B, C, 1), jnp.float32),
        grid=(B, nt),
        in_specs=[
            pl.BlockSpec(memory_space=pltpu.MemorySpace.SMEM),
            pl.BlockSpec((pl.Squeezed(), C, thw), lambda b, t: (b, 0, t)),
        ],
        out_specs=pl.BlockSpec((pl.Squeezed(), C, 1), lambda b, t: (b, 0, 0)),
        compiler_params=pltpu.CompilerParams(
            dimension_semantics=("parallel", "arbitrary"),
            vmem_limit_bytes=vmem_limit,
        ),
        cost_estimate=pool_cost,
    )(w2, x2)

    # Pass 2: scale every HW tile (fully parallel grid).
    scale_cost = pl.CostEstimate(
        flops=B * C * hw,
        transcendentals=0,
        bytes_accessed=2 * B * C * hw * itemsize + B * C * 4,
    )
    extra = {"input_output_aliases": {1: 0}} if donate_x else {}
    out = pl.pallas_call(
        eca_scale_kernel,
        out_shape=jax.ShapeDtypeStruct((B, C, hw), x2.dtype),
        grid=(B, nt),
        in_specs=[
            pl.BlockSpec((pl.Squeezed(), C, 1), lambda b, t: (b, 0, 0)),
            pl.BlockSpec((pl.Squeezed(), C, thw), lambda b, t: (b, 0, t)),
        ],
        out_specs=pl.BlockSpec((pl.Squeezed(), C, thw), lambda b, t: (b, 0, t)),
        compiler_params=pltpu.CompilerParams(
            dimension_semantics=("parallel", "parallel"),
            vmem_limit_bytes=vmem_limit,
        ),
        cost_estimate=scale_cost,
        **extra,
    )(attn, x2)
    return out


# --------------------------------------------------------------------------- #
# Public wrapper.
# --------------------------------------------------------------------------- #
def eca_forward(x, weight, *, donate_x=False, force_tiled=False, tile_hw=None):
    """x: (B, C, H, W), weight: (ksize,) -> (B, C, H, W)."""
    B, C, H, W = x.shape
    ksize = int(weight.shape[-1])
    hw = H * W
    itemsize = jnp.dtype(x.dtype).itemsize

    x2 = x.reshape(B, C, hw)
    w2 = weight.reshape(1, ksize).astype(jnp.float32)
    inv_hw = 1.0 / hw

    vmem_cap = _vmem_capacity_bytes()
    budget = max(vmem_cap - (8 << 20), 32 << 20)     # never request more than exists
    fast_needed = 4 * C * hw * itemsize + (2 << 20)  # in + out blocks, double-buffered

    if (not force_tiled) and fast_needed <= budget:
        vmem_limit = min(max(fast_needed, 32 << 20), budget)
        out = _eca_fused_call(x2, w2, ksize=ksize, inv_hw=inv_hw,
                              vmem_limit=vmem_limit, donate_x=donate_x)
    else:
        out = _eca_tiled_call(x2, w2, ksize=ksize, inv_hw=inv_hw, budget=budget,
                              donate_x=donate_x, tile_hw=tile_hw)
    return out.reshape(B, C, H, W)


def eca_reference(x, weight):
    """Pure-JAX reference mirroring the PyTorch forward."""
    B, C, H, W = x.shape
    ksize = int(weight.shape[-1])
    pad = (ksize - 1) // 2
    pooled = jnp.mean(x, axis=(2, 3))                               # (B, C)
    padded = jnp.pad(pooled, ((0, 0), (pad, pad)))                  # (B, C + 2*pad)
    conv = jnp.zeros_like(pooled)
    for j in range(ksize):
        conv = conv + weight[j] * padded[:, j:j + C]
    attn = jax.nn.sigmoid(conv)[:, :, None, None]                   # (B, C, 1, 1)
    return x * attn


if __name__ == "__main__":
    def run_case(key, B, C, H, W, **kwargs):
        ksize = adaptive_kernel_size(C, b=1, gamma=2)
        kx, kw = jax.random.split(key)
        x = jax.random.normal(kx, (B, C, H, W), dtype=jnp.float32)
        bound = 1.0 / math.sqrt(ksize)
        weight = jax.random.uniform(kw, (ksize,), jnp.float32, -bound, bound)
        ref = eca_reference(x, weight)                 # compute BEFORE any donation
        out = jax.block_until_ready(eca_forward(x, weight, **kwargs))
        assert out.shape == (B, C, H, W)
        assert jnp.allclose(out, ref, atol=1e-5, rtol=1e-5), \
            f"mismatch vs reference at shape {(B, C, H, W)} with {kwargs}"

    key = jax.random.PRNGKey(0)
    k1, k2, k3, k4 = jax.random.split(key, 4)
    run_case(k1, 2, 4, 16, 16)                                   # lane-aligned fast path
    run_case(k2, 2, 8, 7, 7)                                     # hw=49: tail-only path (no pad/slice)
    run_case(k3, 2, 8, 24, 24, donate_x=True)                    # strips + 64-lane tail, in-place output
    run_case(k4, 1, 8, 24, 24, force_tiled=True, tile_hw=128)    # two-pass tiled fallback, partial last tile

    print("KERNEL_OK")
</pallas_src>

<mosaic_0001>
module attributes {stable_mosaic.version = 11 : i64} {
  func.func @eca_fused_kernel(%arg0: i32, %arg1: memref<1x3xf32, #tpu.memory_space<smem>>, %arg2: memref<1x4x256xf32, #tpu.memory_space<vmem>>, %arg3: memref<1x4x256xf32, #tpu.memory_space<vmem>>) attributes {dimension_semantics = [#tpu.dimension_semantics<parallel>], iteration_bounds = array<i64: 2>, scalar_prefetch = 0 : i64, scratch_operands = 0 : i64, tpu.core_type = #tpu.core_type<tc>, window_params = [{transform_indices = @transform_0, window_bounds = array<i64: 1, 3>}, {transform_indices = @transform_1, window_bounds = array<i64: 1, 4, 256>}, {transform_indices = @transform_2, window_bounds = array<i64: 1, 4, 256>}]} {
    %cst = arith.constant 0.000000e+00 : f32
    %0 = vector.broadcast %cst : f32 to vector<4x128xf32>
    %c0 = arith.constant 0 : index
    %c0_0 = arith.constant 0 : index
    %c0_1 = arith.constant 0 : index
    %1 = vector.load %arg2[%c0, %c0_0, %c0_1] : memref<1x4x256xf32, #tpu.memory_space<vmem>>, vector<1x4x128xf32>
    %2 = vector.shape_cast %1 : vector<1x4x128xf32> to vector<4x128xf32>
    %3 = arith.addf %0, %2 : vector<4x128xf32>
    %c0_2 = arith.constant 0 : index
    %c0_3 = arith.constant 0 : index
    %c128 = arith.constant 128 : index
    %4 = vector.load %arg2[%c0_2, %c0_3, %c128] : memref<1x4x256xf32, #tpu.memory_space<vmem>>, vector<1x4x128xf32>
    %5 = vector.shape_cast %4 : vector<1x4x128xf32> to vector<4x128xf32>
    %6 = arith.addf %3, %5 : vector<4x128xf32>
    %cst_4 = arith.constant dense<0.000000e+00> : vector<4xf32>
    %7 = vector.multi_reduction <add>, %6, %cst_4 [1] : vector<4x128xf32> to vector<4xf32>
    %8 = vector.shape_cast %7 : vector<4xf32> to vector<4x1xf32>
    %cst_5 = arith.constant 3.906250e-03 : f32
    %9 = vector.broadcast %cst_5 : f32 to vector<4x1xf32>
    %10 = arith.mulf %8, %9 : vector<4x1xf32>
    %cst_6 = arith.constant 0.000000e+00 : f32
    %11 = vector.broadcast %cst_6 : f32 to vector<1x1xf32>
    %12 = tpu.concatenate %11, %10, %11 in 0 : vector<1x1xf32>, vector<4x1xf32>, vector<1x1xf32> -> vector<6x1xf32>
    %cst_7 = arith.constant 0.000000e+00 : f32
    %13 = vector.broadcast %cst_7 : f32 to vector<4x1xf32>
    %c0_8 = arith.constant 0 : index
    %c0_9 = arith.constant 0 : index
    %14 = memref.load %arg1[%c0_8, %c0_9] : memref<1x3xf32, #tpu.memory_space<smem>>
    %15 = vector.extract_strided_slice %12 {offsets = [0, 0], sizes = [4, 1], strides = [1, 1]} : vector<6x1xf32> to vector<4x1xf32>
    %16 = vector.broadcast %14 : f32 to vector<4x1xf32>
    %17 = arith.mulf %16, %15 : vector<4x1xf32>
    %18 = arith.addf %13, %17 : vector<4x1xf32>
    %c0_10 = arith.constant 0 : index
    %c1 = arith.constant 1 : index
    %19 = memref.load %arg1[%c0_10, %c1] : memref<1x3xf32, #tpu.memory_space<smem>>
    %20 = vector.extract_strided_slice %12 {offsets = [1, 0], sizes = [4, 1], strides = [1, 1]} : vector<6x1xf32> to vector<4x1xf32>
    %21 = vector.broadcast %19 : f32 to vector<4x1xf32>
    %22 = arith.mulf %21, %20 : vector<4x1xf32>
    %23 = arith.addf %18, %22 : vector<4x1xf32>
    %c0_11 = arith.constant 0 : index
    %c2 = arith.constant 2 : index
    %24 = memref.load %arg1[%c0_11, %c2] : memref<1x3xf32, #tpu.memory_space<smem>>
    %25 = vector.extract_strided_slice %12 {offsets = [2, 0], sizes = [4, 1], strides = [1, 1]} : vector<6x1xf32> to vector<4x1xf32>
    %26 = vector.broadcast %24 : f32 to vector<4x1xf32>
    %27 = arith.mulf %26, %25 : vector<4x1xf32>
    %28 = arith.addf %23, %27 : vector<4x1xf32>
    %29 = arith.negf %28 : vector<4x1xf32>
    %30 = math.exp %29 : vector<4x1xf32>
    %cst_12 = arith.constant 1.000000e+00 : f32
    %31 = vector.broadcast %cst_12 : f32 to vector<4x1xf32>
    %32 = arith.addf %31, %30 : vector<4x1xf32>
    %33 = arith.divf %31, %32 : vector<4x1xf32>
    %34 = vector.shape_cast %33 : vector<4x1xf32> to vector<4x1xf32>
    %35 = vector.broadcast %34 : vector<4x1xf32> to vector<4x128xf32>
    %c0_13 = arith.constant 0 : index
    %c0_14 = arith.constant 0 : index
    %c0_15 = arith.constant 0 : index
    %36 = vector.load %arg2[%c0_13, %c0_14, %c0_15] : memref<1x4x256xf32, #tpu.memory_space<vmem>>, vector<1x4x128xf32>
    %37 = vector.shape_cast %36 : vector<1x4x128xf32> to vector<4x128xf32>
    %38 = arith.mulf %37, %35 : vector<4x128xf32>
    %c0_16 = arith.constant 0 : index
    %c0_17 = arith.constant 0 : index
    %c0_18 = arith.constant 0 : index
    %39 = vector.load %arg3[%c0_16, %c0_17, %c0_18] : memref<1x4x256xf32, #tpu.memory_space<vmem>>, vector<1x4x128xf32>
    %40 = vector.shape_cast %39 : vector<1x4x128xf32> to vector<4x128xf32>
    %41 = vector.shape_cast %38 : vector<4x128xf32> to vector<1x4x128xf32>
    tpu.vector_store %arg3[%c0_16, %c0_17, %c0_18], %41 {strides = array<i32>} : memref<1x4x256xf32, #tpu.memory_space<vmem>>, vector<1x4x128xf32>,
    %c0_19 = arith.constant 0 : index
    %c0_20 = arith.constant 0 : index
    %c128_21 = arith.constant 128 : index
    %42 = vector.load %arg2[%c0_19, %c0_20, %c128_21] : memref<1x4x256xf32, #tpu.memory_space<vmem>>, vector<1x4x128xf32>
    %43 = vector.shape_cast %42 : vector<1x4x128xf32> to vector<4x128xf32>
    %44 = arith.mulf %43, %35 : vector<4x128xf32>
    %c0_22 = arith.constant 0 : index
    %c0_23 = arith.constant 0 : index
    %c128_24 = arith.constant 128 : index
    %45 = vector.load %arg3[%c0_22, %c0_23, %c128_24] : memref<1x4x256xf32, #tpu.memory_space<vmem>>, vector<1x4x128xf32>
    %46 = vector.shape_cast %45 : vector<1x4x128xf32> to vector<4x128xf32>
    %47 = vector.shape_cast %44 : vector<4x128xf32> to vector<1x4x128xf32>
    tpu.vector_store %arg3[%c0_22, %c0_23, %c128_24], %47 {strides = array<i32>} : memref<1x4x256xf32, #tpu.memory_space<vmem>>, vector<1x4x128xf32>,
    return
  }
  func.func @transform_0(%arg0: i32) -> (i32, i32) {
    %c0_i32 = arith.constant 0 : i32
    %c0_i32_0 = arith.constant 0 : i32
    %c0_i32_1 = arith.constant 0 : i32
    return %c0_i32, %c0_i32_0 : i32, i32
  }
  func.func @transform_1(%arg0: i32) -> (i32, i32, i32) {
    %c0_i32 = arith.constant 0 : i32
    %c0_i32_0 = arith.constant 0 : i32
    %c0_i32_1 = arith.constant 0 : i32
    return %arg0, %c0_i32, %c0_i32_0 : i32, i32, i32
  }
  func.func @transform_2(%arg0: i32) -> (i32, i32, i32) {
    %c0_i32 = arith.constant 0 : i32
    %c0_i32_0 = arith.constant 0 : i32
    %c0_i32_1 = arith.constant 0 : i32
    return %arg0, %c0_i32, %c0_i32_0 : i32, i32, i32
  }
}

</mosaic_0001>

<bundles_post_ra>
// kernel: tpu_custom_call.1
= control target key start
LH: loop header
LB: loop body
LE: loop exit
PB: predicated region body
PF: predicated region fallthrough
CT: control target
= control target key end

     0   :  { %7 = vsyncpa [#allocation5], 0  ;;  %s692_s0 = inlined_call_operand.hbm [shape: f32[1,3], index: 0, kind: input, shape index: {}]   ;;  %s693_s1 = inlined_call_operand.hbm [shape: f32[2,4,256], index: 1, kind: input, shape index: {}]   ;;  %s694_s2 = inlined_call_operand.hbm [shape: f32[2,4,256], index: 2, kind: output, shape index: {}]  }
   0x1   :  { %8 = vsyncpa [#allocation3], 0 }
   0x2   :  { %10 = vsyncpa [#allocation3 + $0x1], 0 }
   0x3   :  { %11 = vsyncpa [#allocation4], 0 }
   0x4   :  { %13 = vsyncpa [#allocation4 + $0x1], 0  ;;  %s531_s9 = smov 0   ;;  %s533_s10 = smov 0  }
   0x5   :  { %s535_s11 = smov 0   ;;  %s537_s12 = smov 0  }
   0x6 LB: > { %s552_s13 = sadd.s32 4294967295, %s510_s12   ;;  %s319_s14 = sadd.s32 4294967294, %s510_s12   ;;  %s510_s12 = sphi %s537_s12, %s714_s12   ;;  %s506_s11 = sphi %s535_s11, %s713_s11   ;;  %s502_s10 = sphi %s533_s10, %s712_s10   ;;  %s498_s9 = sphi %s531_s9, %s711_s9  }
   0x7   : > { %p60_p0 = scmp.ne.s32.totalorder %s502_s10, %s498_s9  ;;  %p695_p1 = scmp.eq.s32.totalorder %s552_s13, 0 }
   0x8   : > { %p84_p2 = scmp.eq.s32.totalorder %s552_s13, 1  ;;  %p90_p3 = scmp.eq.s32.totalorder %s319_s14, 1 }
   0x9   : > { %p561_p4 = por %p695_p1, %p60_p0  ;;  %p320_p5 = scmp.ge.s32.totalorder %s510_s12, 1 }
   0xa   : > { %p566_p6 = por %p90_p3, %p60_p0  ;;  %p97_p7 = scmp.lt.s32.totalorder %s510_s12, 3 }
   0xb   : > { %s699_s15 = scalar_select %p561_p4, 1, 0 }
   0xc   : > { %s700_s16 = scalar_select %p566_p6, 1, 0 }
   0xd   : > { %p571_p8 = pnand %p320_p5, %p97_p7  ;;  %s577_s18 = sadd.s32 1, %s510_s12  }
   0xe   : > { %s44_s19 = ssub.s32 %s510_s12, %s577_s18  ;;  %s47_s20 = sadd.s32 1, %s506_s11 }
   0xf   : > { %s701_s17 = scalar_select %p571_p8, 1, 0 }
  0x10   : > { %p348_p10 = pneg %p571_p8  ;;  %p45_p12 = scmp.eq.s32.totalorder %s44_s19, 0 }
  0x11   : > { %p54_p13 = scmp.ne.s32.totalorder %s506_s11, %s502_s10  ;;  %p55_p0 = scmp.eq.s32.totalorder %s510_s12, 0 }
  0x12   : > { %p349_p11 = pnand %p348_p10, %p695_p1  ;;  %p361_p3 = scmp.lt.s32.totalorder %s510_s12, 2 }
  0x13   : > { %s512_s21 = smov [#allocation2]   ;;  %p56_p5 = por %p55_p0, %p54_p13 }
  0x14   : > { %351 = dma.hbm_to_smem (!%p349_p11), %s692_s0, 16, %s512_s21, [#allocation5]  }
  0x15   : > { %s594_s24 = scalar_select %p45_p12, %s506_s11, %s47_s20  }
  0x16   : > { %p598_p7 = por %p84_p2, %p54_p13  ;;  %s119_s26 = sand.u32 1, %s506_s11  }
  0x17   : > { %s338_s27 = sshll.u32 %s510_s12, 7  ;;  %s323_s28 = sshll.u32 %s119_s26, 3 }
  0x18   : > { %s702_s25 = scalar_select %p598_p7, 1, 0 }
  0x19   : > { %s607_s3 = scalar_lea.hbm %s693_s1, %s338_s27  ;;  %s123_s4 = scalar_lea.vmem [#allocation6], %s323_s28 }
  0x1a   : > { %s131_s5 = sshll.u32 %s123_s4, 4  ;;  %p609_p10 = pnand %p361_p3, %p56_p5  ;;  %s132_s5 = int_to_ptr.vmem [resolvable:$true] %s131_s5 }
  0x1b   : > { %s120_s7 = scalar_lea.sflag [#allocation3], %s119_s26  ;;  %s414_s8 = scalar_lea.hbm %s607_s3, 128 }
  0x1c   : > { %p415_p2 = scmp.ne.s32.totalorder %s607_s3, %s414_s8  ;;  %p416_p11 = pneg %p609_p10 }
  0x1d   : > { %s419_s20 = scalar_lea.hbm %s693_s1, 256  ;;  %p420_p0 = scmp.lt.s32.totalorder %s607_s3, %s693_s1 }
  0x1e   : > { %p417_p12 = pnand %p416_p11, %p415_p2  ;;  %p421_p3 = scmp.lt.s32.totalorder %s419_s20, %s414_s8 }
  0x20   : > { %p418_p13 = pneg %p417_p12  ;;  %p422_p5 = por %p421_p3, %p420_p0 }
  0x22   : > { %p423_p9 = pnand %p422_p5, %p418_p13 }
  0x24   : > { %426 = shalt.err (!%p423_p9)
}
  0x25   : > { %s427_s23 = scalar_lea.vmem %s132_s5, 128  ;;  %s513_s26 = smov [#allocation6]  }
  0x26   : > { %p428_p1 = scmp.ne.s32.totalorder %s132_s5, %s427_s23  ;;  %s432_s27 = sshll.u32 %s513_s26, 4  ;;  %s433_s27 = int_to_ptr.vmem [resolvable:$false] %s432_s27 }
  0x27   : > { %s434_s28 = scalar_lea.vmem %s433_s27, 256  ;;  %p435_p2 = scmp.lt.s32.totalorder %s132_s5, %s433_s27 }
  0x28   : > { %p430_p6 = pnand %p428_p1, %p416_p11  ;;  %p436_p12 = scmp.lt.s32.totalorder %s434_s28, %s427_s23 }
  0x2a   : > { %p431_p7 = pneg %p430_p6  ;;  %p437_p4 = por %p436_p12, %p435_p2 }
  0x2c   : > { %p438_p8 = pnand %p437_p4, %p431_p7 }
  0x2e   : > { %441 = shalt.err (!%p438_p8)
}
  0x2f   : > { %355 = dma.hbm_to_vmem [thread:$0]  (!%p609_p10), %s607_s3, 128, %s132_s5, %s120_s7  }
  0x30   : > { %p704_p13 = scmp.ne.s32.totalorder %s701_s17, 0 }
  0x31   : > { %p705_p9 = scmp.eq.s32.totalorder (!%p704_p13), %s552_s13, 0 }
  0x32   : > { %140 = sbr.rel (%p704_p13) target bundleno = 389 (0x185), region = 28 }
  0x37   : > { %485 = dma.done.wait (%p705_p9), [#allocation5], 16   ;;  %p706_p1 = pmov %p705_p9 }
  0x38   : > { %s634_s29 = sand.u32 1, %s502_s10   ;;  %p707_p4 = scmp.ne.s32.totalorder %s699_s15, 0 }
  0x39   : > { %487 = vsyncadd (%p706_p1), [#allocation5], 4294967280  ;;  %s328_s30 = sshll.u32 %s634_s29, 3  ;;  %s147_s4 = scalar_lea.sflag [#allocation3], %s634_s29 }
  0x3a   : > { %s640_s3 = scalar_lea.vmem [#allocation6], %s328_s30 }
  0x3b   : > { %489 = dma.done.wait (%p707_p4), %s147_s4, 128  }
  0x3c   : > { %491 = vsyncadd (%p707_p4), %s147_s4, 4294967168 }
  0x3d   : > { %155 = sfence }
  0x3e   : > { %v172_v0 = vld [vmem:[%s640_s3] sm:$0xf]  ;;  %v174_v1 = vld [vmem:[%s640_s3 + $0x4] sm:$0xf]  ;;  %vm176_vm0 = vcmask 1043456   ;;  %v514_v4 = vmov 0  }
  0x3f   : > { %v175_v2 = vadd.f32 %v174_v1, %v172_v0  ;;  %398 = vset.pattern.permute.xlu0 %v514_v4  ;;  %s330_s17 = sld [smem:[#allocation2 + $0x1]]  ;;  %vm184_vm1 = vcmask 1040384   ;;  %vm186_vm2 = vcmask 1044480   ;;  %v219_v24 = vld [vmem:[%s640_s3 + $0x4] sm:$0xf]  ;;  %s339_s15 = sshll.u32 %s552_s13, 7 }
  0x40   : > { %s331_s5 = sld [smem:[#allocation2 + $0x2]]  ;;  %s171_s7 = scalar_lea.vmem [#allocation7], %s328_s30 }
  0x41   : > { %v177_v3 = vsel %vm176_vm0, %v175_v2, 0.0  ;;  %s188_s6 = sld [smem:[#allocation2]]  ;;  %s237_s8 = sshll.u32 %s171_s7, 4  ;;  %s238_s8 = int_to_ptr.vmem [resolvable:$true] %s237_s8 }
  0x42   : > { %178 = vadd.xlane.f32.xlu0 %v177_v3  ;;  %s655_s20 = scalar_lea.hbm %s694_s2, %s339_s15  ;;  %s223_s21 = scalar_lea.sflag [#allocation4], %s634_s29 }
  0x43   : > { %s442_s22 = scalar_lea.vmem %s238_s8, 128  ;;  %p708_p8 = scmp.ne.s32.totalorder %s702_s25, 0 }
  0x44   : > { %p443_p6 = scmp.ne.s32.totalorder %s238_s8, %s442_s22  ;;  %s515_s13 = smov [#allocation7]  }
  0x45   : > { %v193_v8 = vstv %s330_s17  ;;  %s446_s23 = sshll.u32 %s515_s13, 4  ;;  %s447_s23 = int_to_ptr.vmem [resolvable:$false] %s446_s23 }
  0x46   : > { %v200_v9 = vstv %s331_s5  ;;  %p444_p7 = pnand %p443_p6, %p708_p8  ;;  %s448_s26 = scalar_lea.vmem %s447_s23, 256 }
  0x47   : > { %v189_v11 = vstv %s188_s6  ;;  %p449_p11 = scmp.lt.s32.totalorder %s238_s8, %s447_s23  ;;  %p450_p0 = scmp.lt.s32.totalorder %s448_s26, %s442_s22 }
  0x48   : > { %p445_p10 = pneg %p444_p7 }
  0x49   : > { %p451_p3 = por %p450_p0, %p449_p11 }
  0x4b   : > { %p452_p5 = pnand %p451_p3, %p445_p10 }
  0xcb   : > { %v179_v5 = vpop.xlane.xlu0 %178 }
  0xcc   : > { %v180_v6 = vmul.f32 0.00390625, %v179_v5 }
  0xce   : > { %v182_v7 = vrot.slane %v180_v6, 7 }
  0xd0   : > { %v185_v10 = vsel %vm184_vm1, 0.0, %v182_v7 }
  0xd1   : > { %v187_v12 = vsel %vm186_vm2, %v185_v10, 0.0 }
  0xd2   : > { %v194_v13 = vmul.f32 %v193_v8, %v187_v12  ;;  %v201_v14 = vmul.f32 %v200_v9, %v187_v12  ;;  %v190_v15 = vmul.f32 %v189_v11, %v187_v12 }
  0xd4   : > { %v196_v16 = vrot.slane %v194_v13, 1  ;;  %v203_v18 = vrot.slane %v201_v14, 2 }
  0xd6   : > { %v198_v17 = vadd.f32 %v196_v16, %v190_v15 }
  0xd8   : > { %v205_v19 = vadd.f32 %v203_v18, %v198_v17 }
  0xda   : > { %v332_v20 = vmul.f32 -1.442695, %v205_v19 }
  0xdc   : > { %399 = vpow2.f32 %v332_v20 }
  0xe9   : > { %v400_v21 = vpop.eup %399 }
  0xea   : > { %v209_v22 = vadd.f32 1.0, %v400_v21 }
  0xec   : > { %401 = vrcp.f32 %v209_v22 }
  0xf9   : > { %v402_v23 = vpop.eup %401 }
  0xfa   : > { %214 = vperm.xlu0 %398, %v402_v23  }
 0x175   : > { %v215_v25 = vpop.permute.xlu0 %214 }
 0x176   : > { %v217_v26 = vmul.f32 %v215_v25, %v172_v0  ;;  %v220_v27 = vmul.f32 %v219_v24, %v215_v25 }
 0x178   : > { %218 = vst [vmem:[%s171_s7] sm:$0xf] %v217_v26  ;;  %221 = vst [vmem:[%s171_s7 + $0x4] sm:$0xf] %v220_v27 }
 0x179   : > { %455 = shalt.err (!%p452_p5)
}
 0x17a   : > { %s456_s27 = scalar_lea.hbm %s655_s20, 128  ;;  %s460_s30 = scalar_lea.hbm %s694_s2, 256 }
 0x17b   : > { %p457_p2 = scmp.ne.s32.totalorder %s655_s20, %s456_s27  ;;  %p461_p9 = scmp.lt.s32.totalorder %s655_s20, %s694_s2 }
 0x17c   : > { %p462_p1 = scmp.lt.s32.totalorder %s460_s30, %s456_s27 }
 0x17d   : > { %p458_p12 = pnand %p457_p2, %p708_p8 }
 0x17e   : > { %p463_p4 = por %p462_p1, %p461_p9 }
 0x17f   : > { %p459_p13 = pneg %p458_p12 }
 0x181   : > { %p464_p6 = pnand %p463_p4, %p459_p13 }
 0x183   : > { %467 = shalt.err (!%p464_p6)
}
 0x184   : > { %346 = dma.vmem_to_hbm [thread:$0]  (%p708_p8), %s238_s8, 128, %s655_s20, %s223_s21  }
 0x185 PF: > { %s249_s17 = sand.u32 1, %s498_s9   ;;  %p709_p7 = scmp.ne.s32.totalorder %s700_s16, 0 }
 0x186   : > { %p710_p10 = scmp.ge.s32.totalorder %s510_s12, 2  ;;  %s250_s5 = scalar_lea.sflag [#allocation4], %s249_s17 }
 0x188   : > { %p357_p11 = pnand %p710_p10, %p709_p7 }
 0x18a   : > { %p358_p0 = pneg %p357_p11 }
 0x18c   : > { %493 = dma.done.wait (%p358_p0), %s250_s5, 128  }
 0x18d   : > { %495 = vsyncadd (%p358_p0), %s250_s5, 4294967168  ;;  %p16_p3 = scmp.ge.s32.totalorder %s577_s18, 4   ;;  %s711_s9 = smov %s502_s10 }
 0x18e   : > { %s712_s10 = smov %s506_s11  ;;  %s713_s11 = smov %s594_s24 }
 0x18f   : > { %s714_s12 = smov %s577_s18  ;;  %18 = sbr.rel (!%p16_p3) target bundleno = 6 (0x6), region = 78 }
 0x194   :  { %255 = vsyncpa [#allocation3], 1 }
 0x195   :  { %257 = vsyncpa [#allocation3 + $0x1], 1 }
 0x196   :  { %258 = vsyncpa [#allocation4], 1 }
 0x197   :  { %260 = vsyncpa [#allocation4 + $0x1], 1 }
 0x198   :  { %261 = vsyncpa [#allocation5], 1 }
 0x199   :  { %263 = vsyncpa [#allocation5 + $0x1], 1 }

</bundles_post_ra>
